<compile_context>
chip_gen: v7x
topology: tpu7x:2x2x1
jax: 0.10.0
libtpu: 0.0.40
codegen_flags: <defaults>
</compile_context>

<pallas_src>
import functools

import numpy as np

import jax
import jax.numpy as jnp
from jax.experimental import pallas as pl
from jax.experimental.pallas import tpu as pltpu


def _dwsep_kernel(x_ref, wdw_ref, wpw_ref, mask_ref, o_ref, *, H, W, K):
    """One batch element.

    x_ref   : (1, Cin, H*W)   input, spatial flattened onto the lane axis
    wdw_ref : (Cin, K*K)      depthwise weights (tap-major columns)
    wpw_ref : (Cout, Cin)     pointwise weights
    mask_ref: (K*K, H*W)      f32 {0,1} border-validity mask per tap ("same" padding)
    o_ref   : (1, Cout, H*W)  output
    """
    HW = H * W
    pad = K // 2

    x = x_ref[0].astype(jnp.float32)            # (Cin, HW), lane-dense
    wdw = wdw_ref[...].astype(jnp.float32)      # (Cin, K*K), read once
    wpw = wpw_ref[...].astype(jnp.float32)      # (Cout, Cin), read once
    mask = mask_ref[...]                        # (K*K, HW) f32

    # Depthwise KxK: accumulate lane-rotated, border-masked, per-channel-weighted taps.
    acc = None
    for kh in range(K):
        for kw in range(K):
            t = kh * K + kw
            s = (kh - pad) * W + (kw - pad)     # flat shift: out[p] reads in[p + s]
            shifted = x if s == 0 else pltpu.roll(x, shift=(-s) % HW, axis=1)
            coef = wdw[:, t:t + 1] * mask[t:t + 1, :]     # (Cin,1)*(1,HW) -> (Cin, HW)
            term = shifted * coef
            acc = term if acc is None else acc + term

    # Pointwise 1x1 on the VPU: out[co, :] = sum_ci wpw[co, ci] * acc[ci, :].
    Cin = x.shape[0]
    out = None
    for ci in range(Cin):
        term = acc[ci:ci + 1, :] * wpw[:, ci:ci + 1]      # (1,HW)*(Cout,1) -> (Cout,HW)
        out = term if out is None else out + term

    o_ref[0] = out.astype(o_ref.dtype)


def _edge_masks(H, W, K, pad):
    """(K*K, H*W) float32 masks: 1 where the tap reads inside the image, else 0."""
    h_idx = np.repeat(np.arange(H), W)          # (HW,)
    w_idx = np.tile(np.arange(W), H)            # (HW,)
    masks = np.zeros((K * K, H * W), np.float32)
    for kh in range(K):
        for kw in range(K):
            dh, dw = kh - pad, kw - pad
            ok = ((h_idx + dh >= 0) & (h_idx + dh < H) &
                  (w_idx + dw >= 0) & (w_idx + dw < W))
            masks[kh * K + kw] = ok.astype(np.float32)
    return jnp.asarray(masks)


def depthwise_separable_conv(x_nchw, w_dw, w_pw, *, padding=1):
    """x_nchw: (N, Cin, H, W); w_dw: (Cin, 1, K, K); w_pw: (Cout, Cin, 1, 1).

    stride=1, "same" padding (padding == K // 2), no bias — matches the PyTorch module
    config.  Returns (N, Cout, H, W).
    """
    N, Cin, H, W = x_nchw.shape
    K = w_dw.shape[2]
    Cout = w_pw.shape[0]
    if padding != K // 2:
        raise NotImplementedError("kernel implements 'same' padding (padding == K // 2)")

    HW = H * W

    # Contiguous-dim reshapes only (free): no transpose / pad / HBM relayout.
    x_flat = x_nchw.reshape(N, Cin, HW)
    wdw = w_dw.reshape(Cin, K * K)
    wpw = w_pw.reshape(Cout, Cin)
    mask = _edge_masks(H, W, K, padding)        # host constant

    kernel = functools.partial(_dwsep_kernel, H=H, W=W, K=K)

    out_flat = pl.pallas_call(
        kernel,
        out_shape=jax.ShapeDtypeStruct((N, Cout, HW), x_nchw.dtype),
        grid_spec=pltpu.PrefetchScalarGridSpec(
            num_scalar_prefetch=0,
            grid=(N,),
            in_specs=[
                pl.BlockSpec((1, Cin, HW), lambda n: (n, 0, 0)),
                pl.BlockSpec((Cin, K * K), lambda n: (0, 0)),
                pl.BlockSpec((Cout, Cin), lambda n: (0, 0)),
                pl.BlockSpec((K * K, HW), lambda n: (0, 0)),
            ],
            out_specs=pl.BlockSpec((1, Cout, HW), lambda n: (n, 0, 0)),
        ),
        compiler_params=pltpu.CompilerParams(
            dimension_semantics=("parallel",)),
    )(x_flat, wdw, wpw, mask)

    return out_flat.reshape(N, Cout, H, W)


def _reference(x_nchw, w_dw, w_pw, *, padding=1):
    """Pure-JAX reference using lax.conv_general_dilated (matches PyTorch Conv2d)."""
    Cin = x_nchw.shape[1]
    dw = jax.lax.conv_general_dilated(
        x_nchw.astype(jnp.float32), w_dw.astype(jnp.float32),
        window_strides=(1, 1), padding=[(padding, padding), (padding, padding)],
        dimension_numbers=("NCHW", "OIHW", "NCHW"),
        feature_group_count=Cin,
        precision=jax.lax.Precision.HIGHEST)
    pw = jax.lax.conv_general_dilated(
        dw, w_pw.astype(jnp.float32),
        window_strides=(1, 1), padding="VALID",
        dimension_numbers=("NCHW", "OIHW", "NCHW"),
        precision=jax.lax.Precision.HIGHEST)
    return pw.astype(x_nchw.dtype)


if __name__ == "__main__":
    # Module config: in_channels=4, out_channels=8, kernel_size=3, stride=1, padding=1, bias=False
    N, Cin, H, W = 2, 4, 16, 16
    Cout, K, P = 8, 3, 1

    key = jax.random.PRNGKey(0)
    kx, kdw, kpw = jax.random.split(key, 3)

    x = jax.random.normal(kx, (N, Cin, H, W), dtype=jnp.float32)
    # Deterministic parameter init (shapes match nn.Conv2d weights):
    w_dw = jax.random.normal(kdw, (Cin, 1, K, K), dtype=jnp.float32) * 0.1     # depthwise
    w_pw = jax.random.normal(kpw, (Cout, Cin, 1, 1), dtype=jnp.float32) * 0.1  # pointwise

    out = depthwise_separable_conv(x, w_dw, w_pw, padding=P)
    out = jax.block_until_ready(out)

    ref = _reference(x, w_dw, w_pw, padding=P)
    assert out.shape == (N, Cout, H, W), out.shape
    assert jnp.allclose(out, ref, atol=1e-4, rtol=1e-4), float(jnp.max(jnp.abs(out - ref)))

    print("KERNEL_OK")
</pallas_src>

<mosaic_0001>
module attributes {stable_mosaic.version = 11 : i64} {
  func.func @_dwsep_kernel(%arg0: i32, %arg1: memref<1x4x256xf32, #tpu.memory_space<vmem>>, %arg2: memref<4x9xf32, #tpu.memory_space<vmem>>, %arg3: memref<8x4xf32, #tpu.memory_space<vmem>>, %arg4: memref<9x256xf32, #tpu.memory_space<vmem>>, %arg5: memref<1x8x256xf32, #tpu.memory_space<vmem>>) attributes {dimension_semantics = [#tpu.dimension_semantics<parallel>], iteration_bounds = array<i64: 2>, scalar_prefetch = 0 : i64, scratch_operands = 0 : i64, tpu.core_type = #tpu.core_type<tc>, window_params = [{transform_indices = @transform_0, window_bounds = array<i64: 1, 4, 256>}, {pipeline_mode = #tpu.pipeline_mode<synchronous>, transform_indices = @transform_1, window_bounds = array<i64: 4, 9>}, {pipeline_mode = #tpu.pipeline_mode<synchronous>, transform_indices = @transform_2, window_bounds = array<i64: 8, 4>}, {pipeline_mode = #tpu.pipeline_mode<synchronous>, transform_indices = @transform_3, window_bounds = array<i64: 9, 256>}, {transform_indices = @transform_4, window_bounds = array<i64: 1, 8, 256>}]} {
    %c0 = arith.constant 0 : index
    %c0_0 = arith.constant 0 : index
    %c0_1 = arith.constant 0 : index
    %0 = vector.load %arg1[%c0, %c0_0, %c0_1] : memref<1x4x256xf32, #tpu.memory_space<vmem>>, vector<1x4x256xf32>
    %1 = vector.shape_cast %0 : vector<1x4x256xf32> to vector<4x256xf32>
    %c0_2 = arith.constant 0 : index
    %c0_3 = arith.constant 0 : index
    %2 = vector.load %arg2[%c0_2, %c0_3] : memref<4x9xf32, #tpu.memory_space<vmem>>, vector<4x9xf32>
    %c0_4 = arith.constant 0 : index
    %c0_5 = arith.constant 0 : index
    %3 = vector.load %arg3[%c0_4, %c0_5] : memref<8x4xf32, #tpu.memory_space<vmem>>, vector<8x4xf32>
    %c0_6 = arith.constant 0 : index
    %c0_7 = arith.constant 0 : index
    %4 = vector.load %arg4[%c0_6, %c0_7] : memref<9x256xf32, #tpu.memory_space<vmem>>, vector<9x256xf32>
    %c17_i32 = arith.constant 17 : i32
    %5 = tpu.dynamic_rotate %1 by %c17_i32 dim 1 : vector<4x256xf32>, i32 -> vector<4x256xf32>
    %6 = vector.extract_strided_slice %2 {offsets = [0, 0], sizes = [4, 1], strides = [1, 1]} : vector<4x9xf32> to vector<4x1xf32>
    %7 = vector.extract_strided_slice %4 {offsets = [0, 0], sizes = [1, 256], strides = [1, 1]} : vector<9x256xf32> to vector<1x256xf32>
    %8 = vector.broadcast %6 : vector<4x1xf32> to vector<4x256xf32>
    %9 = vector.broadcast %7 : vector<1x256xf32> to vector<4x256xf32>
    %10 = arith.mulf %8, %9 : vector<4x256xf32>
    %11 = arith.mulf %5, %10 : vector<4x256xf32>
    %c16_i32 = arith.constant 16 : i32
    %12 = tpu.dynamic_rotate %1 by %c16_i32 dim 1 : vector<4x256xf32>, i32 -> vector<4x256xf32>
    %13 = vector.extract_strided_slice %2 {offsets = [0, 1], sizes = [4, 1], strides = [1, 1]} : vector<4x9xf32> to vector<4x1xf32>
    %14 = vector.extract_strided_slice %4 {offsets = [1, 0], sizes = [1, 256], strides = [1, 1]} : vector<9x256xf32> to vector<1x256xf32>
    %15 = vector.broadcast %13 : vector<4x1xf32> to vector<4x256xf32>
    %16 = vector.broadcast %14 : vector<1x256xf32> to vector<4x256xf32>
    %17 = arith.mulf %15, %16 : vector<4x256xf32>
    %18 = arith.mulf %12, %17 : vector<4x256xf32>
    %19 = arith.addf %11, %18 : vector<4x256xf32>
    %c15_i32 = arith.constant 15 : i32
    %20 = tpu.dynamic_rotate %1 by %c15_i32 dim 1 : vector<4x256xf32>, i32 -> vector<4x256xf32>
    %21 = vector.extract_strided_slice %2 {offsets = [0, 2], sizes = [4, 1], strides = [1, 1]} : vector<4x9xf32> to vector<4x1xf32>
    %22 = vector.extract_strided_slice %4 {offsets = [2, 0], sizes = [1, 256], strides = [1, 1]} : vector<9x256xf32> to vector<1x256xf32>
    %23 = vector.broadcast %21 : vector<4x1xf32> to vector<4x256xf32>
    %24 = vector.broadcast %22 : vector<1x256xf32> to vector<4x256xf32>
    %25 = arith.mulf %23, %24 : vector<4x256xf32>
    %26 = arith.mulf %20, %25 : vector<4x256xf32>
    %27 = arith.addf %19, %26 : vector<4x256xf32>
    %c1_i32 = arith.constant 1 : i32
    %28 = tpu.dynamic_rotate %1 by %c1_i32 dim 1 : vector<4x256xf32>, i32 -> vector<4x256xf32>
    %29 = vector.extract_strided_slice %2 {offsets = [0, 3], sizes = [4, 1], strides = [1, 1]} : vector<4x9xf32> to vector<4x1xf32>
    %30 = vector.extract_strided_slice %4 {offsets = [3, 0], sizes = [1, 256], strides = [1, 1]} : vector<9x256xf32> to vector<1x256xf32>
    %31 = vector.broadcast %29 : vector<4x1xf32> to vector<4x256xf32>
    %32 = vector.broadcast %30 : vector<1x256xf32> to vector<4x256xf32>
    %33 = arith.mulf %31, %32 : vector<4x256xf32>
    %34 = arith.mulf %28, %33 : vector<4x256xf32>
    %35 = arith.addf %27, %34 : vector<4x256xf32>
    %36 = vector.extract_strided_slice %2 {offsets = [0, 4], sizes = [4, 1], strides = [1, 1]} : vector<4x9xf32> to vector<4x1xf32>
    %37 = vector.extract_strided_slice %4 {offsets = [4, 0], sizes = [1, 256], strides = [1, 1]} : vector<9x256xf32> to vector<1x256xf32>
    %38 = vector.broadcast %36 : vector<4x1xf32> to vector<4x256xf32>
    %39 = vector.broadcast %37 : vector<1x256xf32> to vector<4x256xf32>
    %40 = arith.mulf %38, %39 : vector<4x256xf32>
    %41 = arith.mulf %1, %40 : vector<4x256xf32>
    %42 = arith.addf %35, %41 : vector<4x256xf32>
    %c255_i32 = arith.constant 255 : i32
    %43 = tpu.dynamic_rotate %1 by %c255_i32 dim 1 : vector<4x256xf32>, i32 -> vector<4x256xf32>
    %44 = vector.extract_strided_slice %2 {offsets = [0, 5], sizes = [4, 1], strides = [1, 1]} : vector<4x9xf32> to vector<4x1xf32>
    %45 = vector.extract_strided_slice %4 {offsets = [5, 0], sizes = [1, 256], strides = [1, 1]} : vector<9x256xf32> to vector<1x256xf32>
    %46 = vector.broadcast %44 : vector<4x1xf32> to vector<4x256xf32>
    %47 = vector.broadcast %45 : vector<1x256xf32> to vector<4x256xf32>
    %48 = arith.mulf %46, %47 : vector<4x256xf32>
    %49 = arith.mulf %43, %48 : vector<4x256xf32>
    %50 = arith.addf %42, %49 : vector<4x256xf32>
    %c241_i32 = arith.constant 241 : i32
    %51 = tpu.dynamic_rotate %1 by %c241_i32 dim 1 : vector<4x256xf32>, i32 -> vector<4x256xf32>
    %52 = vector.extract_strided_slice %2 {offsets = [0, 6], sizes = [4, 1], strides = [1, 1]} : vector<4x9xf32> to vector<4x1xf32>
    %53 = vector.extract_strided_slice %4 {offsets = [6, 0], sizes = [1, 256], strides = [1, 1]} : vector<9x256xf32> to vector<1x256xf32>
    %54 = vector.broadcast %52 : vector<4x1xf32> to vector<4x256xf32>
    %55 = vector.broadcast %53 : vector<1x256xf32> to vector<4x256xf32>
    %56 = arith.mulf %54, %55 : vector<4x256xf32>
    %57 = arith.mulf %51, %56 : vector<4x256xf32>
    %58 = arith.addf %50, %57 : vector<4x256xf32>
    %c240_i32 = arith.constant 240 : i32
    %59 = tpu.dynamic_rotate %1 by %c240_i32 dim 1 : vector<4x256xf32>, i32 -> vector<4x256xf32>
    %60 = vector.extract_strided_slice %2 {offsets = [0, 7], sizes = [4, 1], strides = [1, 1]} : vector<4x9xf32> to vector<4x1xf32>
    %61 = vector.extract_strided_slice %4 {offsets = [7, 0], sizes = [1, 256], strides = [1, 1]} : vector<9x256xf32> to vector<1x256xf32>
    %62 = vector.broadcast %60 : vector<4x1xf32> to vector<4x256xf32>
    %63 = vector.broadcast %61 : vector<1x256xf32> to vector<4x256xf32>
    %64 = arith.mulf %62, %63 : vector<4x256xf32>
    %65 = arith.mulf %59, %64 : vector<4x256xf32>
    %66 = arith.addf %58, %65 : vector<4x256xf32>
    %c239_i32 = arith.constant 239 : i32
    %67 = tpu.dynamic_rotate %1 by %c239_i32 dim 1 : vector<4x256xf32>, i32 -> vector<4x256xf32>
    %68 = vector.extract_strided_slice %2 {offsets = [0, 8], sizes = [4, 1], strides = [1, 1]} : vector<4x9xf32> to vector<4x1xf32>
    %69 = vector.extract_strided_slice %4 {offsets = [8, 0], sizes = [1, 256], strides = [1, 1]} : vector<9x256xf32> to vector<1x256xf32>
    %70 = vector.broadcast %68 : vector<4x1xf32> to vector<4x256xf32>
    %71 = vector.broadcast %69 : vector<1x256xf32> to vector<4x256xf32>
    %72 = arith.mulf %70, %71 : vector<4x256xf32>
    %73 = arith.mulf %67, %72 : vector<4x256xf32>
    %74 = arith.addf %66, %73 : vector<4x256xf32>
    %75 = vector.extract_strided_slice %74 {offsets = [0, 0], sizes = [1, 256], strides = [1, 1]} : vector<4x256xf32> to vector<1x256xf32>
    %76 = vector.extract_strided_slice %3 {offsets = [0, 0], sizes = [8, 1], strides = [1, 1]} : vector<8x4xf32> to vector<8x1xf32>
    %77 = vector.broadcast %75 : vector<1x256xf32> to vector<8x256xf32>
    %78 = vector.broadcast %76 : vector<8x1xf32> to vector<8x256xf32>
    %79 = arith.mulf %77, %78 : vector<8x256xf32>
    %80 = vector.extract_strided_slice %74 {offsets = [1, 0], sizes = [1, 256], strides = [1, 1]} : vector<4x256xf32> to vector<1x256xf32>
    %81 = vector.extract_strided_slice %3 {offsets = [0, 1], sizes = [8, 1], strides = [1, 1]} : vector<8x4xf32> to vector<8x1xf32>
    %82 = vector.broadcast %80 : vector<1x256xf32> to vector<8x256xf32>
    %83 = vector.broadcast %81 : vector<8x1xf32> to vector<8x256xf32>
    %84 = arith.mulf %82, %83 : vector<8x256xf32>
    %85 = arith.addf %79, %84 : vector<8x256xf32>
    %86 = vector.extract_strided_slice %74 {offsets = [2, 0], sizes = [1, 256], strides = [1, 1]} : vector<4x256xf32> to vector<1x256xf32>
    %87 = vector.extract_strided_slice %3 {offsets = [0, 2], sizes = [8, 1], strides = [1, 1]} : vector<8x4xf32> to vector<8x1xf32>
    %88 = vector.broadcast %86 : vector<1x256xf32> to vector<8x256xf32>
    %89 = vector.broadcast %87 : vector<8x1xf32> to vector<8x256xf32>
    %90 = arith.mulf %88, %89 : vector<8x256xf32>
    %91 = arith.addf %85, %90 : vector<8x256xf32>
    %92 = vector.extract_strided_slice %74 {offsets = [3, 0], sizes = [1, 256], strides = [1, 1]} : vector<4x256xf32> to vector<1x256xf32>
    %93 = vector.extract_strided_slice %3 {offsets = [0, 3], sizes = [8, 1], strides = [1, 1]} : vector<8x4xf32> to vector<8x1xf32>
    %94 = vector.broadcast %92 : vector<1x256xf32> to vector<8x256xf32>
    %95 = vector.broadcast %93 : vector<8x1xf32> to vector<8x256xf32>
    %96 = arith.mulf %94, %95 : vector<8x256xf32>
    %97 = arith.addf %91, %96 : vector<8x256xf32>
    %c0_8 = arith.constant 0 : index
    %c0_9 = arith.constant 0 : index
    %c0_10 = arith.constant 0 : index
    %98 = vector.load %arg5[%c0_8, %c0_9, %c0_10] : memref<1x8x256xf32, #tpu.memory_space<vmem>>, vector<1x8x256xf32>
    %99 = vector.shape_cast %98 : vector<1x8x256xf32> to vector<8x256xf32>
    %100 = vector.shape_cast %97 : vector<8x256xf32> to vector<1x8x256xf32>
    tpu.vector_store %arg5[%c0_8, %c0_9, %c0_10], %100 {strides = array<i32>} : memref<1x8x256xf32, #tpu.memory_space<vmem>>, vector<1x8x256xf32>,
    return
  }
  func.func @transform_0(%arg0: i32) -> (i32, i32, i32) {
    %c0_i32 = arith.constant 0 : i32
    %c0_i32_0 = arith.constant 0 : i32
    %c0_i32_1 = arith.constant 0 : i32
    return %arg0, %c0_i32, %c0_i32_0 : i32, i32, i32
  }
  func.func @transform_1(%arg0: i32) -> (i32, i32) {
    %c0_i32 = arith.constant 0 : i32
    %c0_i32_0 = arith.constant 0 : i32
    %c0_i32_1 = arith.constant 0 : i32
    return %c0_i32, %c0_i32_0 : i32, i32
  }
  func.func @transform_2(%arg0: i32) -> (i32, i32) {
    %c0_i32 = arith.constant 0 : i32
    %c0_i32_0 = arith.constant 0 : i32
    %c0_i32_1 = arith.constant 0 : i32
    return %c0_i32, %c0_i32_0 : i32, i32
  }
  func.func @transform_3(%arg0: i32) -> (i32, i32) {
    %c0_i32 = arith.constant 0 : i32
    %c0_i32_0 = arith.constant 0 : i32
    %c0_i32_1 = arith.constant 0 : i32
    return %c0_i32, %c0_i32_0 : i32, i32
  }
  func.func @transform_4(%arg0: i32) -> (i32, i32, i32) {
    %c0_i32 = arith.constant 0 : i32
    %c0_i32_0 = arith.constant 0 : i32
    %c0_i32_1 = arith.constant 0 : i32
    return %arg0, %c0_i32, %c0_i32_0 : i32, i32, i32
  }
}

</mosaic_0001>

<bundles_post_ra>
// kernel: tpu_custom_call.1
= control target key start
LH: loop header
LB: loop body
LE: loop exit
PB: predicated region body
PF: predicated region fallthrough
CT: control target
= control target key end

     0   :  { %9 = vsyncpa [#allocation3], 0  ;;  %s1220_s0 = inlined_call_operand.hbm [shape: f32[2,4,256], index: 0, kind: input, shape index: {}]   ;;  %s1221_s1 = inlined_call_operand.vmem [shape: f32[4,9], index: 1, kind: input, shape index: {}]   ;;  %s1222_s2 = inlined_call_operand.vmem [shape: f32[8,4], index: 2, kind: input, shape index: {}]   ;;  %s1223_s3 = inlined_call_operand.hbm [shape: f32[9,256], index: 3, kind: input, shape index: {}]   ;;  %s1224_s4 = inlined_call_operand.hbm [shape: f32[2,8,256], index: 4, kind: output, shape index: {}]  }
   0x1   :  { %11 = vsyncpa [#allocation3 + $0x1], 0 }
   0x2   :  { %12 = vsyncpa [#allocation6], 0 }
   0x3   :  { %13 = vsyncpa [#allocation4], 0 }
   0x4   :  { %15 = vsyncpa [#allocation4 + $0x1], 0  ;;  %s912_s15 = smov 0   ;;  %s914_s16 = smov 0  }
   0x5   :  { %s916_s17 = smov 0   ;;  %s918_s18 = smov 0  }
   0x6 LB: > { %s933_s19 = sadd.s32 4294967295, %s863_s18   ;;  %s624_s20 = sadd.s32 4294967294, %s863_s18   ;;  %s863_s18 = sphi %s918_s18, %s1244_s18   ;;  %s859_s17 = sphi %s916_s17, %s1243_s17   ;;  %s855_s16 = sphi %s914_s16, %s1242_s16   ;;  %s851_s15 = sphi %s912_s15, %s1241_s15  }
   0x7   : > { %p41_p0 = scmp.ne.s32.totalorder %s855_s16, %s851_s15  ;;  %p1225_p1 = scmp.eq.s32.totalorder %s933_s19, 0 }
   0x8   : > { %p134_p3 = scmp.eq.s32.totalorder %s624_s20, 1  ;;  %p625_p5 = scmp.ge.s32.totalorder %s863_s18, 1 }
   0x9   : > { %p942_p4 = por %p1225_p1, %p41_p0  ;;  %p141_p7 = scmp.lt.s32.totalorder %s863_s18, 3 }
   0xa   : > { %p947_p6 = por %p134_p3, %p41_p0  ;;  %s865_s24 = smov [#allocation5]  }
   0xb   : > { %s1228_s21 = scalar_select %p942_p4, 1, 0 }
   0xc   : > { %s1229_s22 = scalar_select %p947_p6, 1, 0 }
   0xd   : > { %p952_p8 = pnand %p625_p5, %p141_p7  ;;  %s159_s25 = sshll.u32 %s865_s24, 4  ;;  %s956_s25 = int_to_ptr.vmem [resolvable:$true] %s159_s25 }
   0xe   : > { %s968_s27 = sadd.s32 1, %s863_s18   ;;  %s28_s28 = sadd.s32 1, %s859_s17 }
   0xf   : > { %s1230_s23 = scalar_select %p952_p8, 1, 0 }
  0x10   : > { %p652_p9 = pneg %p952_p8  ;;  %s25_s29 = ssub.s32 %s863_s18, %s968_s27 }
  0x11   : > { %s735_s6 = scalar_lea.hbm %s1223_s3, 512 }
  0x12   : > { %p963_p11 = pnand %p652_p9, %p1225_p1  ;;  %p736_p12 = scmp.ne.s32.totalorder %s1223_s3, %s735_s6 }
  0x13   : > { %p742_p5 = scmp.lt.u32.totalorder %s735_s6, %s1223_s3 }
  0x14   : > { %p737_p13 = pneg %p963_p11 }
  0x16   : > { %p738_p0 = pnand %p737_p13, %p736_p12 }
  0x18   : > { %p739_p3 = pneg %p738_p0 }
  0x1a   : > { %p744_p7 = pnand %p742_p5, %p739_p3 }
  0x1c   : > { %747 = shalt.err (!%p744_p7)
}
  0x1d   : > { %s748_s11 = scalar_lea.vmem %s956_s25, 512  ;;  %p756_p2 = scmp.lt.s32.totalorder %s956_s25, %s956_s25 }
  0x1e   : > { %p749_p9 = scmp.ne.s32.totalorder %s956_s25, %s748_s11  ;;  %p757_p6 = scmp.lt.s32.totalorder %s748_s11, %s748_s11 }
  0x20   : > { %p751_p10 = pnand %p749_p9, %p737_p13  ;;  %p758_p4 = por %p757_p6, %p756_p2 }
  0x22   : > { %p752_p1 = pneg %p751_p10 }
  0x24   : > { %p759_p8 = pnand %p758_p4, %p752_p1 }
  0x26   : > { %762 = shalt.err (!%p759_p8)
}
  0x27   : > { %s866_s12 = smov 256   ;;  %s867_s13 = smov 16  }
  0x28   : > { %655 = dma.hbm_to_vmem [thread:$0]  (!%p963_p11), %s1223_s3, 512, %s956_s25, [#allocation6], %s866_s12, %s866_s12, %s867_s13  }
  0x29   : > { %p26_p2 = scmp.eq.s32.totalorder %s25_s29, 0  ;;  %p35_p1 = scmp.ne.s32.totalorder %s859_s17, %s855_s16 }
  0x2a   : > { %p36_p4 = scmp.eq.s32.totalorder %s863_s18, 0  ;;  %p665_p6 = scmp.lt.s32.totalorder %s863_s18, 2 }
  0x2b   : > { %s999_s24 = scalar_select %p26_p2, %s859_s17, %s28_s28  }
  0x2c   : > { %p37_p8 = por %p36_p4, %p35_p1  ;;  %p1232_p10 = scmp.eq.s32.totalorder %s933_s19, 1 }
  0x2d   : > { %s173_s5 = sand.u32 1, %s859_s17   ;;  %s642_s6 = sshll.u32 %s863_s18, 7 }
  0x2e   : > { %p1003_p12 = por %p1232_p10, %p35_p1  ;;  %s628_s7 = sshll.u32 %s173_s5, 3 }
  0x2f   : > { %s1012_s9 = scalar_lea.hbm %s1220_s0, %s642_s6  ;;  %s177_s25 = scalar_lea.vmem [#allocation2], %s628_s7 }
  0x30   : > { %s185_s28 = sshll.u32 %s177_s25, 4  ;;  %p1014_p11 = pnand %p665_p6, %p37_p8  ;;  %s1018_s28 = int_to_ptr.vmem [resolvable:$true] %s185_s28 }
  0x31   : > { %s174_s10 = scalar_lea.sflag [#allocation3], %s173_s5  ;;  %s763_s11 = scalar_lea.hbm %s1012_s9, 128 }
  0x32   : > { %p764_p13 = scmp.ne.s32.totalorder %s1012_s9, %s763_s11  ;;  %p765_p0 = pneg %p1014_p11 }
  0x33   : > { %s768_s14 = scalar_lea.hbm %s1220_s0, 256  ;;  %p769_p7 = scmp.lt.u32.totalorder %s1012_s9, %s1220_s0 }
  0x34   : > { %p766_p3 = pnand %p765_p0, %p764_p13  ;;  %p770_p9 = scmp.lt.u32.totalorder %s768_s14, %s763_s11 }
  0x35   : > { %p772_p1 = scmp.lt.u32.totalorder %s763_s11, %s1012_s9 }
  0x36   : > { %p767_p5 = pneg %p766_p3  ;;  %p771_p2 = por %p770_p9, %p769_p7 }
  0x38   : > { %p773_p4 = por %p772_p1, %p771_p2 }
  0x3a   : > { %p774_p6 = pnand %p773_p4, %p767_p5 }
  0x3c   : > { %777 = shalt.err (!%p774_p6)
}
  0x3d   : > { %s778_s5 = scalar_lea.vmem %s1018_s28, 128  ;;  %s868_s7 = smov [#allocation2]  }
  0x3e   : > { %p779_p8 = scmp.ne.s32.totalorder %s1018_s28, %s778_s5  ;;  %s783_s26 = sshll.u32 %s868_s7, 4  ;;  %s784_s26 = int_to_ptr.vmem [resolvable:$false] %s783_s26 }
  0x3f   : > { %s785_s8 = scalar_lea.vmem %s784_s26, 256  ;;  %p786_p3 = scmp.lt.s32.totalorder %s1018_s28, %s784_s26 }
  0x40   : > { %p781_p10 = pnand %p779_p8, %p765_p0  ;;  %p787_p7 = scmp.lt.s32.totalorder %s785_s8, %s778_s5 }
  0x42   : > { %p782_p13 = pneg %p781_p10  ;;  %p788_p9 = por %p787_p7, %p786_p3 }
  0x44   : > { %p789_p2 = pnand %p788_p9, %p782_p13 }
  0x46   : > { %792 = shalt.err (!%p789_p2)
}
  0x47   : > { %659 = dma.hbm_to_vmem [thread:$0]  (!%p1014_p11), %s1012_s9, 128, %s1018_s28, %s174_s10  }
  0x48   : > { %p1235_p5 = scmp.ne.s32.totalorder %s1230_s23, 0 }
  0x49   : > { %s1048_s25 = sand.u32 (!%p1235_p5), 1, %s855_s16   ;;  %p1236_p0 = scmp.ne.s32.totalorder (!%p1235_p5), %s1228_s21, 0 }
  0x4a   : > { %194 = sbr.rel (%p1235_p5) target bundleno = 301 (0x12d), region = 36  ;;  %s632_s11 = sshll.u32 (!%p1235_p5), %s1048_s25, 3 }
  0x4b   : > { %s197_s12 = scalar_lea.sflag (!%p1235_p5), [#allocation3], %s1048_s25  ;;  %s200_s13 = scalar_lea.vmem (!%p1235_p5), [#allocation2], %s632_s11 }
  0x51   : > { %838 = dma.done.wait (%p1236_p0), %s197_s12, 128  }
  0x52   : > { %840 = vsyncadd (%p1236_p0), %s197_s12, 4294967168  ;;  %p1237_p1 = scmp.eq.s32.totalorder %s933_s19, 0 }
  0x54   : > { %842 = dma.done.wait (%p1237_p1), [#allocation6], 512   ;;  %p1238_p11 = pmov %p1237_p1 }
  0x55   : > { %v869_v0 = vmov 2   ;;  %v870_v1 = vmov 0   ;;  %v230_v2 = vld [vmem:[%s1221_s1] sm:$0xf]  ;;  %v871_v3 = vmov 4   ;;  %v872_v4 = vmov 1  }
  0x56   : > { %844 = vsyncadd (%p1238_p11), [#allocation6], 4294966784  ;;  %722 = vset.pattern.permute.xlu1 %v869_v0  ;;  %720 = vset.pattern.permute.xlu0 %v870_v1  ;;  %v1063_v5 = vld [vmem:[%s200_s13] sm:$0xff]  ;;  %v873_v6 = vmov 3   ;;  %s874_s21 = smov 17   ;;  %v875_v8 = vmov 5   ;;  %v243_v23 = vlaneseq }
  0x57   : > { %298 = vperm.xlu1 %722, %v230_v2   ;;  %250 = vperm.xlu0 %720, %v230_v2   ;;  %v237_v7 = vcombine.high %v1063_v5, %v1063_v5  ;;  %s876_s28 = smov 16   ;;  %v877_v9 = vmov 8   ;;  %v878_v10 = vmov 6   ;;  %s879_s29 = smov 15   ;;  %v880_v11 = vmov 7   ;;  %v231_v12 = vld [vmem:[%s1222_s2] sm:$0xff] }
  0x58   : > { %s881_s10 = smov 1   ;;  %s882_s14 = smov 127   ;;  %v1080_v25 = vshrl.u32 %v243_v23, 7  ;;  %v1091_v31 = vld [vmem:[#allocation5] sm:$0xff]  ;;  %v1096_v33 = vld [vmem:[#allocation5 + $0x8] sm:$0xff]  ;;  %v1101_v35 = vand.u32 127, %v243_v23 }
  0x59   : > { %s883_s20 = smov 113   ;;  %s884_s6 = smov 112  }
  0x5a   : > { %s885_s5 = smov 111   ;;  %v346_v27 = vsub.s32 4, %v1080_v25  ;;  %v1086_v28 = vsub.s32 1, %v1080_v25  ;;  %v1089_v30 = vsub.s32 2, %v1080_v25  ;;  %v1094_v32 = vsub.s32 0, %v1080_v25  ;;  %s634_s8 = sshll.u32 %s1048_s25, 4 }
  0x5b   : > { %723 = vset.pattern.permute.xlu1 %v871_v3  ;;  %721 = vset.pattern.permute.xlu0 %v872_v4  ;;  %v1099_v34 = vsub.s32 3, %v1080_v25  ;;  %vm269_vm0 = vcmp.lt.s32.totalorder %v1101_v35, 16  ;;  %vm245_vm1 = vcmp.lt.s32.totalorder %v1101_v35, 17  ;;  %vm294_vm2 = vcmp.lt.s32.totalorder %v1101_v35, 15  ;;  %s643_s11 = sshll.u32 %s933_s19, 8  ;;  %s228_s12 = scalar_lea.vmem [#allocation7], %s634_s8 }
  0x5c   : > { %341 = vperm.xlu1 %723, %v230_v2   ;;  %273 = vperm.xlu0 %721, %v230_v2   ;;  %v347_v36 = vrot.slane %v1091_v31, %v346_v27  ;;  %v351_v37 = vrot.slane %v1096_v33, %v346_v27  ;;  %v279_v38 = vrot.slane %v1091_v31, %v1086_v28  ;;  %v377_v55 = vsub.s32 5, %v1080_v25  ;;  %s544_s13 = sshll.u32 %s228_s12, 4  ;;  %s530_s19 = scalar_lea.sflag [#allocation4], %s1048_s25  ;;  %s1178_s13 = int_to_ptr.vmem [resolvable:$true] %s544_s13 }
  0x5d   : > { %v283_v39 = vrot.slane %v1096_v33, %v1086_v28  ;;  %v304_v42 = vrot.slane %v1091_v31, %v1089_v30  ;;  %v308_v43 = vrot.slane %v1096_v33, %v1089_v30  ;;  %v256_v44 = vrot.slane %v1091_v31, %v1094_v32 }
  0x5e   : > { %v260_v45 = vrot.slane %v1096_v33, %v1094_v32  ;;  %v329_v46 = vrot.slane %v1091_v31, %v1099_v34  ;;  %v333_v47 = vrot.slane %v1096_v33, %v1099_v34  ;;  %v402_v56 = vsub.s32 6, %v1080_v25 }
  0x5f   : > { %vm319_vm3 = vcmp.lt.s32.totalorder %v1101_v35, 1  ;;  %vm368_vm4 = vcmp.lt.s32.totalorder %v1101_v35, 127  ;;  %vm393_vm5 = vcmp.lt.s32.totalorder %v1101_v35, 113  ;;  %vm418_vm6 = vcmp.lt.s32.totalorder %v1101_v35, 112 }
  0x60   : > { %724 = vset.pattern.permute.xlu1 %v873_v6  ;;  %239 = vrot.lane.b32.xlu0 %v1063_v5, %s874_s21  ;;  %vm443_vm7 = vcmp.lt.s32.totalorder %v1101_v35, 111 }
  0x61   : > { %323 = vperm.xlu1 %724, %v230_v2   ;;  %725 = vset.pattern.permute.xlu0 %v875_v8 }
  0x64   : > { %265 = vrot.lane.b32.xlu0 %v1063_v5, %s876_s28 }
  0x65   : > { %241 = vrot.lane.b32.xlu1 %v237_v7, %s874_s21  ;;  %s1176_s21 = scalar_lea.hbm %s1224_s4, %s643_s11 }
  0x66   : > { %728 = vset.pattern.permute.xlu1 %v877_v9 }
  0x68   : > { %372 = vperm.xlu0 %725, %v230_v2  }
  0x69   : > { %267 = vrot.lane.b32.xlu1 %v237_v7, %s876_s28  ;;  %s793_s28 = scalar_lea.vmem %s1178_s13, 256 }
  0x6a   : > { %p794_p4 = scmp.ne.s32.totalorder %s1178_s13, %s793_s28 }
  0x6c   : > { %726 = vset.pattern.permute.xlu0 %v878_v10  ;;  %p795_p6 = pnand %p794_p4, %p1003_p12 }
  0x6d   : > { %290 = vrot.lane.b32.xlu1 %v1063_v5, %s879_s29  ;;  %397 = vperm.xlu0 %726, %v230_v2  }
  0x6e   : > { %p796_p8 = pneg %p795_p6 }
  0x71   : > { %292 = vrot.lane.b32.xlu1 %v237_v7, %s879_s29  ;;  %727 = vset.pattern.permute.xlu0 %v880_v11  ;;  %s886_s29 = smov [#allocation7]  }
  0x72   : > { %422 = vperm.xlu0 %727, %v230_v2  }
  0x75   : > { %315 = vrot.lane.b32.xlu1 %v1063_v5, %s881_s10 }
  0x76   : > { %366 = vrot.lane.b32.xlu0 %v237_v7, %s882_s14 }
  0x77   : > { %730 = vset.pattern.permute.xlu0 %v872_v4 }
  0x79   : > { %317 = vrot.lane.b32.xlu1 %v237_v7, %s881_s10  ;;  %s797_s10 = sshll.u32 %s886_s29, 4  ;;  %s798_s10 = int_to_ptr.vmem [resolvable:$false] %s797_s10 }
  0x7a   : > { %391 = vrot.lane.b32.xlu0 %v237_v7, %s883_s20  ;;  %p800_p10 = scmp.lt.s32.totalorder %s1178_s13, %s798_s10 }
  0x7d   : > { %447 = vperm.xlu1 %728, %v230_v2  }
  0x7e   : > { %416 = vrot.lane.b32.xlu0 %v237_v7, %s884_s6 }
  0x81   : > { %364 = vrot.lane.b32.xlu1 %v1063_v5, %s882_s14  ;;  %s799_s14 = scalar_lea.vmem %s798_s10, 512 }
  0x82   : > { %441 = vrot.lane.b32.xlu0 %v237_v7, %s885_s5  ;;  %729 = vset.pattern.permute.xlu1 %v870_v1  ;;  %p801_p13 = scmp.lt.s32.totalorder %s799_s14, %s793_s28 }
  0x84   : > { %p802_p3 = por %p801_p13, %p800_p10 }
  0x85   : > { %389 = vrot.lane.b32.xlu1 %v1063_v5, %s883_s20 }
  0x86   : > { %488 = vperm.xlu0 %730, %v231_v12   ;;  %p803_p7 = pnand %p802_p3, %p796_p8 }
  0x89   : > { %414 = vrot.lane.b32.xlu1 %v1063_v5, %s884_s6 }
  0x8a   : > { %733 = vset.pattern.permute.xlu0 %v873_v6 }
  0x8d   : > { %439 = vrot.lane.b32.xlu1 %v1063_v5, %s885_s5 }
  0x91   : > { %474 = vperm.xlu1 %729, %v231_v12  }
  0x95   : > { %731 = vset.pattern.permute.xlu1 %v869_v0 }
  0x96   : > { %504 = vperm.xlu1 %731, %v231_v12  }
  0x9a   : > { %732 = vset.pattern.permute.xlu1 %v873_v6 }
  0x9b   : > { %520 = vperm.xlu1 %732, %v231_v12  }
  0xd6   : > { %v299_v13 = vpop.permute.xlu1 %298  ;;  %v251_v14 = vpop.permute.xlu0 %250 }
  0xd7   : > { %v309_v57 = vmul.f32 %v304_v42, %v299_v13  ;;  %v261_v58 = vmul.f32 %v256_v44, %v251_v14  ;;  %v262_v59 = vmul.f32 %v260_v45, %v251_v14  ;;  %v310_v1 = vmul.f32 %v308_v43, %v299_v13 }
  0xdb   : > { %v342_v15 = vpop.permute.xlu1 %341  ;;  %v274_v16 = vpop.permute.xlu0 %273 }
  0xdc   : > { %v352_v48 = vmul.f32 %v347_v36, %v342_v15  ;;  %v353_v49 = vmul.f32 %v351_v37, %v342_v15  ;;  %v284_v50 = vmul.f32 %v279_v38, %v274_v16  ;;  %v285_v51 = vmul.f32 %v283_v39, %v274_v16 }
  0xdd   : > { %v378_v16 = vrot.slane %v1091_v31, %v377_v55  ;;  %v407_v38 = vrot.slane %v1096_v33, %v402_v56 }
  0xde   : > { %v356_v2 = vcombine.low %v352_v48, %v353_v49 }
  0xdf   : > { %v240_v17 = vpop.permute.xlu0 %239 }
  0xe0   : > { %v324_v18 = vpop.permute.xlu1 %323  ;;  %v358_v27 = vmul.f32 %v356_v2, %v1063_v5 }
  0xe1   : > { %v334_v7 = vmul.f32 %v329_v46, %v324_v18  ;;  %v335_v8 = vmul.f32 %v333_v47, %v324_v18 }
  0xe2   : > { %v360_v47 = vcombine.high %v358_v27, %v358_v27 }
  0xe3   : > { %v266_v19 = vpop.permute.xlu0 %265 }
  0xe4   : > { %v242_v20 = vpop.permute.xlu1 %241 }
  0xe5   : > { %v246_v61 = vsel %vm245_vm1, %v240_v17, %v242_v20  ;;  %v247_v62 = vsel %vm245_vm1, %v242_v20, %v240_v17  ;;  %v382_v17 = vrot.slane %v1096_v33, %v377_v55 }
  0xe6   : > { %v263_v11 = vmul.f32 %v261_v58, %v247_v62  ;;  %v264_v12 = vmul.f32 %v262_v59, %v246_v61  ;;  %v635_v59 = vld [vmem:[#allocation5 + $0x10] ss:$0 sm:$0xff] }
  0xe7   : > { %v1078_v22 = vpop.permute.xlu0 %372 }
  0xe8   : > { %v268_v21 = vpop.permute.xlu1 %267  ;;  %v383_v5 = vmul.f32 %v378_v16, %v1078_v22  ;;  %v384_v43 = vmul.f32 %v382_v17, %v1078_v22 }
  0xe9   : > { %v270_v53 = vsel %vm269_vm0, %v266_v19, %v268_v21  ;;  %v271_v54 = vsel %vm269_vm0, %v268_v21, %v266_v19  ;;  %v427_v19 = vsub.s32 7, %v1080_v25 }
  0xea   : > { %v286_v3 = vmul.f32 %v284_v50, %v271_v54  ;;  %v287_v4 = vmul.f32 %v285_v51, %v270_v53 }
  0xeb   : > { %v428_v25 = vrot.slane %v1091_v31, %v427_v19  ;;  %v432_v39 = vrot.slane %v1096_v33, %v427_v19 }
  0xec   : > { %v291_v24 = vpop.permute.xlu1 %290  ;;  %v1082_v26 = vpop.permute.xlu0 %397  ;;  %v288_v13 = vadd.f32 %v286_v3, %v263_v11  ;;  %v289_v20 = vadd.f32 %v287_v4, %v264_v12 }
  0xed   : > { %v409_v33 = vmul.f32 %v407_v38, %v1082_v26 }
  0xf0   : > { %v293_v29 = vpop.permute.xlu1 %292 }
  0xf1   : > { %v1109_v41 = vpop.permute.xlu0 %422  ;;  %v295_v63 = vsel %vm294_vm2, %v291_v24, %v293_v29  ;;  %v296_v0 = vsel %vm294_vm2, %v293_v29, %v291_v24  ;;  %v403_v29 = vrot.slane %v1091_v31, %v402_v56 }
  0xf2   : > { %v311_v14 = vmul.f32 %v309_v57, %v296_v0  ;;  %v312_v15 = vmul.f32 %v310_v1, %v295_v63  ;;  %v433_v53 = vmul.f32 %v428_v25, %v1109_v41  ;;  %v434_v54 = vmul.f32 %v432_v39, %v1109_v41 }
  0xf3   : > { %v408_v31 = vmul.f32 %v403_v29, %v1082_v26 }
  0xf4   : > { %v316_v40 = vpop.permute.xlu1 %315  ;;  %v313_v36 = vadd.f32 %v311_v14, %v288_v13  ;;  %v314_v37 = vadd.f32 %v312_v15, %v289_v20 }
  0xf5   : > { %v367_v60 = vpop.permute.xlu0 %366 }
  0xf8   : > { %v318_v52 = vpop.permute.xlu1 %317 }
  0xf9   : > { %v320_v9 = vsel %vm319_vm3, %v316_v40, %v318_v52  ;;  %v321_v10 = vsel %vm319_vm3, %v318_v52, %v316_v40  ;;  %v392_v24 = vpop.permute.xlu0 %391 }
  0xfa   : > { %v336_v21 = vmul.f32 %v334_v7, %v321_v10  ;;  %v337_v23 = vmul.f32 %v335_v8, %v320_v9 }
  0xfc   : > { %v448_v6 = vpop.permute.xlu1 %447  ;;  %v338_v44 = vadd.f32 %v336_v21, %v313_v36  ;;  %v339_v45 = vadd.f32 %v337_v23, %v314_v37 }
  0xfd   : > { %v417_v52 = vpop.permute.xlu0 %416  ;;  %v458_v41 = vmul.f32 %v635_v59, %v448_v6 }
  0xfe   : > { %v362_v22 = vadd.f32 %v358_v27, %v338_v44  ;;  %v363_v55 = vadd.f32 %v360_v47, %v339_v45 }
 0x100   : > { %v365_v18 = vpop.permute.xlu1 %364 }
 0x101   : > { %v369_v40 = vsel %vm368_vm4, %v365_v18, %v367_v60  ;;  %v370_v42 = vsel %vm368_vm4, %v367_v60, %v365_v18  ;;  %v636_v60 = vld [vmem:[#allocation5 + $0x18] ss:$0 sm:$0xff]  ;;  %v442_v7 = vpop.permute.xlu0 %441 }
 0x102   : > { %v385_v50 = vmul.f32 %v383_v5, %v369_v40  ;;  %v386_v51 = vmul.f32 %v384_v43, %v370_v42  ;;  %v459_v2 = vmul.f32 %v636_v60, %v448_v6 }
 0x104   : > { %v390_v46 = vpop.permute.xlu1 %389  ;;  %v387_v62 = vadd.f32 %v385_v50, %v362_v22  ;;  %v388_v63 = vadd.f32 %v386_v51, %v363_v55 }
 0x105   : > { %v394_v48 = vsel %vm393_vm5, %v390_v46, %v392_v24  ;;  %v395_v49 = vsel %vm393_vm5, %v392_v24, %v390_v46  ;;  %v489_v19 = vpop.permute.xlu0 %488 }
 0x106   : > { %v410_v56 = vmul.f32 %v408_v31, %v394_v48  ;;  %v411_v57 = vmul.f32 %v409_v33, %v395_v49 }
 0x108   : > { %v415_v58 = vpop.permute.xlu1 %414  ;;  %v412_v3 = vadd.f32 %v410_v56, %v387_v62  ;;  %v413_v4 = vadd.f32 %v411_v57, %v388_v63 }
 0x109   : > { %v419_v61 = vsel %vm418_vm6, %v415_v58, %v417_v52  ;;  %v420_v26 = vsel %vm418_vm6, %v417_v52, %v415_v58 }
 0x10a   : > { %v435_v0 = vmul.f32 %v433_v53, %v419_v61  ;;  %v436_v1 = vmul.f32 %v434_v54, %v420_v26 }
 0x10c   : > { %v440_v8 = vpop.permute.xlu1 %439  ;;  %v437_v11 = vadd.f32 %v435_v0, %v412_v3  ;;  %v438_v12 = vadd.f32 %v436_v1, %v413_v4 }
 0x10d   : > { %v444_v9 = vsel %vm443_vm7, %v440_v8, %v442_v7  ;;  %v445_v10 = vsel %vm443_vm7, %v442_v7, %v440_v8 }
 0x10e   : > { %v460_v14 = vmul.f32 %v458_v41, %v444_v9  ;;  %v461_v15 = vmul.f32 %v459_v2, %v445_v10 }
 0x110   : > { %v462_v16 = vadd.f32 %v460_v14, %v437_v11  ;;  %v463_v17 = vadd.f32 %v461_v15, %v438_v12  ;;  %v475_v35 = vpop.permute.xlu1 %474 }
 0x112   : > { %v467_v13 = vrot.slane %v462_v16, %v1094_v32  ;;  %v471_v20 = vrot.slane %v463_v17, %v1094_v32  ;;  %v482_v6 = vrot.slane %v462_v16, %v1086_v28  ;;  %v486_v21 = vrot.slane %v463_v17, %v1086_v28 }
 0x113   : > { %v498_v29 = vrot.slane %v462_v16, %v1089_v30  ;;  %v502_v36 = vrot.slane %v463_v17, %v1089_v30  ;;  %v514_v32 = vrot.slane %v462_v16, %v1099_v34  ;;  %v518_v28 = vrot.slane %v463_v17, %v1099_v34 }
 0x114   : > { %v477_v23 = vmul.f32 %v475_v35, %v467_v13  ;;  %v478_v24 = vmul.f32 %v475_v35, %v471_v20  ;;  %v491_v18 = vmul.f32 %v489_v19, %v482_v6  ;;  %v492_v27 = vmul.f32 %v489_v19, %v486_v21 }
 0x115   : > { %v505_v37 = vpop.permute.xlu1 %504 }
 0x116   : > { %v493_v38 = vadd.f32 %v491_v18, %v477_v23  ;;  %v494_v25 = vadd.f32 %v492_v27, %v478_v24  ;;  %v507_v39 = vmul.f32 %v505_v37, %v498_v29  ;;  %v508_v40 = vmul.f32 %v505_v37, %v502_v36 }
 0x118   : > { %v509_v5 = vadd.f32 %v507_v39, %v493_v38  ;;  %v510_v43 = vadd.f32 %v508_v40, %v494_v25 }
 0x11a   : > { %v521_v42 = vpop.permute.xlu1 %520 }
 0x11b   : > { %v523_v44 = vmul.f32 %v521_v42, %v514_v32  ;;  %v524_v45 = vmul.f32 %v521_v42, %v518_v28 }
 0x11d   : > { %v525_v30 = vadd.f32 %v523_v44, %v509_v5  ;;  %v526_v46 = vadd.f32 %v524_v45, %v510_v43 }
 0x11f   : > { %527 = vst [vmem:[%s228_s12] sm:$0xff] %v525_v30  ;;  %528 = vst [vmem:[%s228_s12 + $0x8] sm:$0xff] %v526_v46 }
 0x120   : > { %806 = shalt.err (!%p803_p7)
}
 0x121   : > { %s807_s25 = scalar_lea.hbm %s1176_s21, 256  ;;  %s811_s5 = scalar_lea.hbm %s1224_s4, 512 }
 0x122   : > { %p808_p9 = scmp.ne.s32.totalorder %s1176_s21, %s807_s25  ;;  %p812_p0 = scmp.lt.u32.totalorder %s1176_s21, %s1224_s4 }
 0x123   : > { %p813_p1 = scmp.lt.u32.totalorder %s811_s5, %s807_s25  ;;  %p815_p4 = scmp.lt.u32.totalorder %s807_s25, %s1176_s21 }
 0x124   : > { %p809_p2 = pnand %p808_p9, %p1003_p12 }
 0x125   : > { %p814_p11 = por %p813_p1, %p812_p0 }
 0x126   : > { %p810_p5 = pneg %p809_p2 }
 0x127   : > { %p816_p6 = por %p815_p4, %p814_p11 }
 0x129   : > { %p817_p8 = pnand %p816_p6, %p810_p5 }
 0x12b   : > { %820 = shalt.err (!%p817_p8)
}
 0x12c   : > { %650 = dma.vmem_to_hbm [thread:$0]  (%p1003_p12), %s1178_s13, 256, %s1176_s21, %s530_s19  }
 0x12d PF: > { %s556_s8 = sand.u32 1, %s851_s15   ;;  %p1239_p10 = scmp.ne.s32.totalorder %s1229_s22, 0 }
 0x12e   : > { %p1240_p13 = scmp.ge.s32.totalorder %s863_s18, 2  ;;  %s557_s11 = scalar_lea.sflag [#allocation4], %s556_s8 }
 0x130   : > { %p661_p3 = pnand %p1240_p13, %p1239_p10 }
 0x132   : > { %846 = dma.done.wait (!%p661_p3), %s557_s11, 256  }
 0x133   : > { %848 = vsyncadd (!%p661_p3), %s557_s11, 4294967040  ;;  %p18_p7 = scmp.ge.s32.totalorder %s968_s27, 4   ;;  %s1241_s15 = smov %s855_s16 }
 0x134   : > { %s1242_s16 = smov %s859_s17  ;;  %s1243_s17 = smov %s999_s24 }
 0x135   : > { %s1244_s18 = smov %s968_s27  ;;  %20 = sbr.rel (!%p18_p7) target bundleno = 6 (0x6), region = 85 }
 0x13c   :  { %562 = vsyncpa [#allocation3], 1 }
 0x13d   :  { %564 = vsyncpa [#allocation3 + $0x1], 1 }
 0x13e   :  { %565 = vsyncpa [#allocation6], 1 }
 0x13f   :  { %566 = vsyncpa [#allocation4], 1 }
 0x140   :  { %568 = vsyncpa [#allocation4 + $0x1], 1 }

</bundles_post_ra>
